<compile_context>
chip_gen: v7x
topology: tpu7x:2x2x1
jax: 0.10.0
libtpu: 0.0.40
codegen_flags: <defaults>
</compile_context>

<pallas_src>
import jax
import jax.numpy as jnp
import numpy as np
from jax.experimental import pallas as pl
from jax.experimental.pallas import tpu as pltpu


def make_chebgcn_kernel(B, N, Cin, K):
    """Build the fused ChebGCN forward kernel (single invocation)."""

    def kernel(xf_ref, emb_ref, erep_ref, tile_ref, wflat_ref, bpool_ref,
               out_ref, supp_s, xgr_s):
        E = emb_ref[...]                                             # [N, D]

        # ---- adjacency: A = softmax(relu(E @ E^T), axis=1) ----
        logits = jax.lax.dot_general(E, E, (((1,), (1,)), ((), ())),
                                     preferred_element_type=jnp.float32)
        logits = jnp.maximum(logits, 0.0)
        logits = logits - jnp.max(logits, axis=1, keepdims=True)
        p = jnp.exp(logits)
        A = p / jnp.sum(p, axis=1, keepdims=True)                    # [N, N]

        # ---- Chebyshev supports stacked along rows: supp_s[k*N:(k+1)*N] = T_k
        eye = (jax.lax.broadcasted_iota(jnp.int32, (N, N), 0) ==
               jax.lax.broadcasted_iota(jnp.int32, (N, N), 1)).astype(jnp.float32)
        supp_s[0:N, :] = eye
        supp_s[N:2 * N, :] = A
        t_prev, t_cur = eye, A
        for k in range(2, K):
            t_next = 2.0 * jnp.dot(A, t_cur,
                                   preferred_element_type=jnp.float32) - t_prev
            supp_s[k * N:(k + 1) * N, :] = t_next
            t_prev, t_cur = t_cur, t_next

        # ---- ONE fused graph-diffusion matmul (all k / batch / channels) ----
        # xf[m, b*Cin+i] = x[b, m, i]  ->  xg_all[k*N+n, b*Cin+i] = x_g[b,k,n,i]
        xg_all = jnp.dot(supp_s[...], xf_ref[...],
                         preferred_element_type=jnp.float32)         # [K*N, B*Cin]

        # ---- rearrange to rows=(b,n), cols=(k,i): tiny static block copies ----
        for b in range(B):
            for k in range(K):
                xgr_s[b * N:(b + 1) * N, k * Cin:(k + 1) * Cin] = (
                    xg_all[k * N:(k + 1) * N, b * Cin:(b + 1) * Cin])
        xg_rows = xgr_s[...]                                          # [B*N, K*Cin]

        # ---- u[(b,n),(d,k,i)] = E[n,d] * x_g[b,k,n,i] ----
        # tile_ref is a constant 0/1 replication matrix: the lane-tiling of
        # xg_rows across the D embedding slots runs on the MXU.
        xg_tiled = jnp.dot(xg_rows, tile_ref[...],
                           preferred_element_type=jnp.float32)        # [B*N, D*K*Cin]
        u = erep_ref[...] * xg_tiled                                   # VPU

        # ---- main contraction against pool-form weights (single MXU matmul) ----
        y = jnp.dot(u, wflat_ref[...],
                    preferred_element_type=jnp.float32)                # [B*N, Cout]
        bias_n = jnp.dot(E, bpool_ref[...],
                         preferred_element_type=jnp.float32)           # [N, Cout]
        for b in range(B):
            out_ref[b * N:(b + 1) * N, :] = y[b * N:(b + 1) * N, :] + bias_n

    return kernel


def chebgcn_forward(x, node_emb, weights_pool, bias_pool, *, cheb_k):
    """x: [B, N, Cin]; node_emb: [N, D]; weights_pool: [D, K, Cin, Cout];
    bias_pool: [D, Cout]  ->  [B, N, Cout]."""
    B, N, Cin = x.shape
    D = node_emb.shape[1]
    K = cheb_k
    Cout = weights_pool.shape[-1]
    KC = K * Cin
    DKC = D * KC

    # Pure-layout precompute (no matmuls): transpose / repeat / tile / reshape.
    x_flat = jnp.transpose(x, (1, 0, 2)).reshape(N, B * Cin)          # [N, B*Cin]
    e_rep = jnp.tile(jnp.repeat(node_emb, KC, axis=1), (B, 1))        # [B*N, DKC]
    tile_mat = jnp.tile(jnp.eye(KC, dtype=jnp.float32), (1, D))       # [KC, DKC]
    w_flat = weights_pool.reshape(DKC, Cout)                          # (d,k,i)-major

    kernel = make_chebgcn_kernel(B, N, Cin, K)

    y = pl.pallas_call(
        kernel,
        out_shape=jax.ShapeDtypeStruct((B * N, Cout), jnp.float32),
        grid_spec=pltpu.PrefetchScalarGridSpec(
            num_scalar_prefetch=0,
            grid=(1,),
            in_specs=[
                pl.BlockSpec((N, B * Cin), lambda i: (0, 0)),
                pl.BlockSpec((N, D), lambda i: (0, 0)),
                pl.BlockSpec((B * N, DKC), lambda i: (0, 0)),
                pl.BlockSpec((KC, DKC), lambda i: (0, 0)),
                pl.BlockSpec((DKC, Cout), lambda i: (0, 0)),
                pl.BlockSpec((D, Cout), lambda i: (0, 0)),
            ],
            out_specs=pl.BlockSpec((B * N, Cout), lambda i: (0, 0)),
            scratch_shapes=[
                pltpu.VMEM((K * N, N), jnp.float32),     # stacked supports
                pltpu.VMEM((B * N, KC), jnp.float32),    # xg in (b,n)-row layout
            ],
        ),
        compiler_params=pltpu.CompilerParams(
            dimension_semantics=("arbitrary",)),
    )(x_flat, node_emb, e_rep, tile_mat, w_flat, bias_pool)

    return y.reshape(B, N, Cout)


def chebgcn_reference(x, node_emb, weights_pool, bias_pool, *, cheb_k):
    """Pure-JAX mirror of the PyTorch ChebGCN.forward."""
    N = node_emb.shape[0]
    A = jax.nn.softmax(jax.nn.relu(node_emb @ node_emb.T), axis=1)
    supports = [jnp.eye(N, dtype=jnp.float32), A]
    for _ in range(2, cheb_k):
        supports.append(2.0 * A @ supports[-1] - supports[-2])
    S = jnp.stack(supports, axis=0)                                   # [K, N, N]
    weights = jnp.einsum("nd,dkio->nkio", node_emb, weights_pool)     # [N,K,Cin,Cout]
    bias = node_emb @ bias_pool                                       # [N, Cout]
    x_g = jnp.einsum("knm,bmc->bknc", S, x)
    x_g = jnp.transpose(x_g, (0, 2, 1, 3))                            # [B,N,K,Cin]
    return jnp.einsum("bnki,nkio->bno", x_g, weights) + bias


if __name__ == "__main__":
    # Small, module-consistent shapes.
    B, N = 2, 16          # batch, nodes
    CIN, COUT = 4, 32     # in_dim, out_dim
    K, EMB = 3, 8         # cheb_k, embed_dim

    key = jax.random.PRNGKey(0)
    k0, k1, k2, k3 = jax.random.split(key, 4)

    x = jax.random.normal(k0, (B, N, CIN), jnp.float32)
    node_emb = 0.3 * jax.random.normal(k1, (N, EMB), jnp.float32)
    weights_pool = 0.1 * jax.random.normal(k2, (EMB, K, CIN, COUT), jnp.float32)
    bias_pool = 0.1 * jax.random.normal(k3, (EMB, COUT), jnp.float32)

    out = chebgcn_forward(x, node_emb, weights_pool, bias_pool, cheb_k=K)
    out = jax.block_until_ready(out)
    assert out.shape == (B, N, COUT)

    with jax.default_matmul_precision("float32"):
        ref = chebgcn_reference(x, node_emb, weights_pool, bias_pool, cheb_k=K)
    ref = jax.block_until_ready(ref)

    np.testing.assert_allclose(np.asarray(out), np.asarray(ref),
                               rtol=2e-3, atol=2e-3)
    print("KERNEL_OK")
</pallas_src>

<mosaic_0001>
module attributes {stable_mosaic.version = 11 : i64} {
  func.func @kernel(%arg0: i32, %arg1: memref<16x8xf32, #tpu.memory_space<vmem>>, %arg2: memref<16x8xf32, #tpu.memory_space<vmem>>, %arg3: memref<32x96xf32, #tpu.memory_space<vmem>>, %arg4: memref<12x96xf32, #tpu.memory_space<vmem>>, %arg5: memref<96x32xf32, #tpu.memory_space<vmem>>, %arg6: memref<8x32xf32, #tpu.memory_space<vmem>>, %arg7: memref<32x32xf32, #tpu.memory_space<vmem>>, %arg8: memref<48x16xf32, #tpu.memory_space<vmem>>, %arg9: memref<32x12xf32, #tpu.memory_space<vmem>>) attributes {dimension_semantics = [#tpu.dimension_semantics<arbitrary>], iteration_bounds = array<i64: 1>, scalar_prefetch = 0 : i64, scratch_operands = 2 : i64, tpu.core_type = #tpu.core_type<tc>, window_params = [{pipeline_mode = #tpu.pipeline_mode<synchronous>, transform_indices = @transform_0, window_bounds = array<i64: 16, 8>}, {pipeline_mode = #tpu.pipeline_mode<synchronous>, transform_indices = @transform_1, window_bounds = array<i64: 16, 8>}, {pipeline_mode = #tpu.pipeline_mode<synchronous>, transform_indices = @transform_2, window_bounds = array<i64: 32, 96>}, {pipeline_mode = #tpu.pipeline_mode<synchronous>, transform_indices = @transform_3, window_bounds = array<i64: 12, 96>}, {pipeline_mode = #tpu.pipeline_mode<synchronous>, transform_indices = @transform_4, window_bounds = array<i64: 96, 32>}, {pipeline_mode = #tpu.pipeline_mode<synchronous>, transform_indices = @transform_5, window_bounds = array<i64: 8, 32>}, {pipeline_mode = #tpu.pipeline_mode<synchronous>, transform_indices = @transform_6, window_bounds = array<i64: 32, 32>}]} {
    %c0 = arith.constant 0 : index
    %c0_0 = arith.constant 0 : index
    %0 = vector.load %arg2[%c0, %c0_0] : memref<16x8xf32, #tpu.memory_space<vmem>>, vector<16x8xf32>
    %cst = arith.constant dense<0.000000e+00> : vector<16x16xf32>
    %1 = tpu.matmul %0, %0, %cst {dimension_numbers = #tpu.dot_dimension_numbers<[1], [1], [0], [0], [0, 0, 1, 0], [], []>} : vector<16x8xf32>, vector<16x8xf32>, vector<16x16xf32> -> vector<16x16xf32>
    %cst_1 = arith.constant 0.000000e+00 : f32
    %2 = vector.broadcast %cst_1 : f32 to vector<16x16xf32>
    %3 = arith.maximumf %1, %2 : vector<16x16xf32>
    %cst_2 = arith.constant dense<0xFF800000> : vector<16xf32>
    %4 = vector.multi_reduction <maximumf>, %3, %cst_2 [1] : vector<16x16xf32> to vector<16xf32>
    %5 = vector.shape_cast %4 : vector<16xf32> to vector<16x1xf32>
    %6 = vector.broadcast %5 : vector<16x1xf32> to vector<16x16xf32>
    %7 = arith.subf %3, %6 : vector<16x16xf32>
    %8 = math.exp %7 : vector<16x16xf32>
    %cst_3 = arith.constant dense<0.000000e+00> : vector<16xf32>
    %9 = vector.multi_reduction <add>, %8, %cst_3 [1] : vector<16x16xf32> to vector<16xf32>
    %10 = vector.shape_cast %9 : vector<16xf32> to vector<16x1xf32>
    %11 = vector.broadcast %10 : vector<16x1xf32> to vector<16x16xf32>
    %12 = arith.divf %8, %11 : vector<16x16xf32>
    %13 = tpu.iota {dimensions = array<i32: 0>} : vector<16x16xi32>
    %14 = tpu.iota {dimensions = array<i32: 1>} : vector<16x16xi32>
    %15 = arith.cmpi eq, %13, %14 : vector<16x16xi32>
    %16 = arith.extui %15 : vector<16x16xi1> to vector<16x16xi32>
    %17 = arith.sitofp %16 : vector<16x16xi32> to vector<16x16xf32>
    %c0_4 = arith.constant 0 : index
    %c0_5 = arith.constant 0 : index
    %18 = vector.load %arg8[%c0_4, %c0_5] : memref<48x16xf32, #tpu.memory_space<vmem>>, vector<16x16xf32>
    tpu.vector_store %arg8[%c0_4, %c0_5], %17 {strides = array<i32>} : memref<48x16xf32, #tpu.memory_space<vmem>>, vector<16x16xf32>,
    %c16 = arith.constant 16 : index
    %c0_6 = arith.constant 0 : index
    %19 = vector.load %arg8[%c16, %c0_6] : memref<48x16xf32, #tpu.memory_space<vmem>>, vector<16x16xf32>
    tpu.vector_store %arg8[%c16, %c0_6], %12 {strides = array<i32>} : memref<48x16xf32, #tpu.memory_space<vmem>>, vector<16x16xf32>,
    %cst_7 = arith.constant dense<0.000000e+00> : vector<16x16xf32>
    %20 = tpu.matmul %12, %12, %cst_7 {dimension_numbers = #tpu.dot_dimension_numbers<[1], [0], [0], [1], [0, 0, 1, 1], [], []>} : vector<16x16xf32>, vector<16x16xf32>, vector<16x16xf32> -> vector<16x16xf32>
    %cst_8 = arith.constant 2.000000e+00 : f32
    %21 = vector.broadcast %cst_8 : f32 to vector<16x16xf32>
    %22 = arith.mulf %21, %20 : vector<16x16xf32>
    %23 = arith.subf %22, %17 : vector<16x16xf32>
    %c32 = arith.constant 32 : index
    %c0_9 = arith.constant 0 : index
    %24 = vector.load %arg8[%c32, %c0_9] : memref<48x16xf32, #tpu.memory_space<vmem>>, vector<16x16xf32>
    tpu.vector_store %arg8[%c32, %c0_9], %23 {strides = array<i32>} : memref<48x16xf32, #tpu.memory_space<vmem>>, vector<16x16xf32>,
    %c0_10 = arith.constant 0 : index
    %c0_11 = arith.constant 0 : index
    %25 = vector.load %arg8[%c0_10, %c0_11] : memref<48x16xf32, #tpu.memory_space<vmem>>, vector<48x16xf32>
    %c0_12 = arith.constant 0 : index
    %c0_13 = arith.constant 0 : index
    %26 = vector.load %arg1[%c0_12, %c0_13] : memref<16x8xf32, #tpu.memory_space<vmem>>, vector<16x8xf32>
    %cst_14 = arith.constant dense<0.000000e+00> : vector<48x8xf32>
    %27 = tpu.matmul %25, %26, %cst_14 {dimension_numbers = #tpu.dot_dimension_numbers<[1], [0], [0], [1], [0, 0, 1, 1], [], []>} : vector<48x16xf32>, vector<16x8xf32>, vector<48x8xf32> -> vector<48x8xf32>
    %28 = vector.extract_strided_slice %27 {offsets = [0, 0], sizes = [16, 4], strides = [1, 1]} : vector<48x8xf32> to vector<16x4xf32>
    %c0_15 = arith.constant 0 : index
    %c0_16 = arith.constant 0 : index
    %29 = vector.load %arg9[%c0_15, %c0_16] : memref<32x12xf32, #tpu.memory_space<vmem>>, vector<16x4xf32>
    tpu.vector_store %arg9[%c0_15, %c0_16], %28 {strides = array<i32>} : memref<32x12xf32, #tpu.memory_space<vmem>>, vector<16x4xf32>,
    %30 = vector.extract_strided_slice %27 {offsets = [16, 0], sizes = [16, 4], strides = [1, 1]} : vector<48x8xf32> to vector<16x4xf32>
    %c0_17 = arith.constant 0 : index
    %c4 = arith.constant 4 : index
    %31 = vector.load %arg9[%c0_17, %c4] : memref<32x12xf32, #tpu.memory_space<vmem>>, vector<16x4xf32>
    tpu.vector_store %arg9[%c0_17, %c4], %30 {strides = array<i32>} : memref<32x12xf32, #tpu.memory_space<vmem>>, vector<16x4xf32>,
    %32 = vector.extract_strided_slice %27 {offsets = [32, 0], sizes = [16, 4], strides = [1, 1]} : vector<48x8xf32> to vector<16x4xf32>
    %c0_18 = arith.constant 0 : index
    %c8 = arith.constant 8 : index
    %33 = vector.load %arg9[%c0_18, %c8] : memref<32x12xf32, #tpu.memory_space<vmem>>, vector<16x4xf32>
    tpu.vector_store %arg9[%c0_18, %c8], %32 {strides = array<i32>} : memref<32x12xf32, #tpu.memory_space<vmem>>, vector<16x4xf32>,
    %34 = vector.extract_strided_slice %27 {offsets = [0, 4], sizes = [16, 4], strides = [1, 1]} : vector<48x8xf32> to vector<16x4xf32>
    %c16_19 = arith.constant 16 : index
    %c0_20 = arith.constant 0 : index
    %35 = vector.load %arg9[%c16_19, %c0_20] : memref<32x12xf32, #tpu.memory_space<vmem>>, vector<16x4xf32>
    tpu.vector_store %arg9[%c16_19, %c0_20], %34 {strides = array<i32>} : memref<32x12xf32, #tpu.memory_space<vmem>>, vector<16x4xf32>,
    %36 = vector.extract_strided_slice %27 {offsets = [16, 4], sizes = [16, 4], strides = [1, 1]} : vector<48x8xf32> to vector<16x4xf32>
    %c16_21 = arith.constant 16 : index
    %c4_22 = arith.constant 4 : index
    %37 = vector.load %arg9[%c16_21, %c4_22] : memref<32x12xf32, #tpu.memory_space<vmem>>, vector<16x4xf32>
    tpu.vector_store %arg9[%c16_21, %c4_22], %36 {strides = array<i32>} : memref<32x12xf32, #tpu.memory_space<vmem>>, vector<16x4xf32>,
    %38 = vector.extract_strided_slice %27 {offsets = [32, 4], sizes = [16, 4], strides = [1, 1]} : vector<48x8xf32> to vector<16x4xf32>
    %c16_23 = arith.constant 16 : index
    %c8_24 = arith.constant 8 : index
    %39 = vector.load %arg9[%c16_23, %c8_24] : memref<32x12xf32, #tpu.memory_space<vmem>>, vector<16x4xf32>
    tpu.vector_store %arg9[%c16_23, %c8_24], %38 {strides = array<i32>} : memref<32x12xf32, #tpu.memory_space<vmem>>, vector<16x4xf32>,
    %c0_25 = arith.constant 0 : index
    %c0_26 = arith.constant 0 : index
    %40 = vector.load %arg9[%c0_25, %c0_26] : memref<32x12xf32, #tpu.memory_space<vmem>>, vector<32x12xf32>
    %c0_27 = arith.constant 0 : index
    %c0_28 = arith.constant 0 : index
    %41 = vector.load %arg4[%c0_27, %c0_28] : memref<12x96xf32, #tpu.memory_space<vmem>>, vector<12x96xf32>
    %cst_29 = arith.constant dense<0.000000e+00> : vector<32x96xf32>
    %42 = tpu.matmul %40, %41, %cst_29 {dimension_numbers = #tpu.dot_dimension_numbers<[1], [0], [0], [1], [0, 0, 1, 1], [], []>} : vector<32x12xf32>, vector<12x96xf32>, vector<32x96xf32> -> vector<32x96xf32>
    %c0_30 = arith.constant 0 : index
    %c0_31 = arith.constant 0 : index
    %43 = vector.load %arg3[%c0_30, %c0_31] : memref<32x96xf32, #tpu.memory_space<vmem>>, vector<32x96xf32>
    %44 = arith.mulf %43, %42 : vector<32x96xf32>
    %c0_32 = arith.constant 0 : index
    %c0_33 = arith.constant 0 : index
    %45 = vector.load %arg5[%c0_32, %c0_33] : memref<96x32xf32, #tpu.memory_space<vmem>>, vector<96x32xf32>
    %cst_34 = arith.constant dense<0.000000e+00> : vector<32x32xf32>
    %46 = tpu.matmul %44, %45, %cst_34 {dimension_numbers = #tpu.dot_dimension_numbers<[1], [0], [0], [1], [0, 0, 1, 1], [], []>} : vector<32x96xf32>, vector<96x32xf32>, vector<32x32xf32> -> vector<32x32xf32>
    %c0_35 = arith.constant 0 : index
    %c0_36 = arith.constant 0 : index
    %47 = vector.load %arg6[%c0_35, %c0_36] : memref<8x32xf32, #tpu.memory_space<vmem>>, vector<8x32xf32>
    %cst_37 = arith.constant dense<0.000000e+00> : vector<16x32xf32>
    %48 = tpu.matmul %0, %47, %cst_37 {dimension_numbers = #tpu.dot_dimension_numbers<[1], [0], [0], [1], [0, 0, 1, 1], [], []>} : vector<16x8xf32>, vector<8x32xf32>, vector<16x32xf32> -> vector<16x32xf32>
    %49 = vector.extract_strided_slice %46 {offsets = [0, 0], sizes = [16, 32], strides = [1, 1]} : vector<32x32xf32> to vector<16x32xf32>
    %50 = arith.addf %49, %48 : vector<16x32xf32>
    %c0_38 = arith.constant 0 : index
    %c0_39 = arith.constant 0 : index
    %51 = vector.load %arg7[%c0_38, %c0_39] : memref<32x32xf32, #tpu.memory_space<vmem>>, vector<16x32xf32>
    tpu.vector_store %arg7[%c0_38, %c0_39], %50 {strides = array<i32>} : memref<32x32xf32, #tpu.memory_space<vmem>>, vector<16x32xf32>,
    %52 = vector.extract_strided_slice %46 {offsets = [16, 0], sizes = [16, 32], strides = [1, 1]} : vector<32x32xf32> to vector<16x32xf32>
    %53 = arith.addf %52, %48 : vector<16x32xf32>
    %c16_40 = arith.constant 16 : index
    %c0_41 = arith.constant 0 : index
    %54 = vector.load %arg7[%c16_40, %c0_41] : memref<32x32xf32, #tpu.memory_space<vmem>>, vector<16x32xf32>
    tpu.vector_store %arg7[%c16_40, %c0_41], %53 {strides = array<i32>} : memref<32x32xf32, #tpu.memory_space<vmem>>, vector<16x32xf32>,
    return
  }
  func.func @transform_0(%arg0: i32) -> (i32, i32) {
    %c0_i32 = arith.constant 0 : i32
    %c0_i32_0 = arith.constant 0 : i32
    %c0_i32_1 = arith.constant 0 : i32
    return %c0_i32, %c0_i32_0 : i32, i32
  }
  func.func @transform_1(%arg0: i32) -> (i32, i32) {
    %c0_i32 = arith.constant 0 : i32
    %c0_i32_0 = arith.constant 0 : i32
    %c0_i32_1 = arith.constant 0 : i32
    return %c0_i32, %c0_i32_0 : i32, i32
  }
  func.func @transform_2(%arg0: i32) -> (i32, i32) {
    %c0_i32 = arith.constant 0 : i32
    %c0_i32_0 = arith.constant 0 : i32
    %c0_i32_1 = arith.constant 0 : i32
    return %c0_i32, %c0_i32_0 : i32, i32
  }
  func.func @transform_3(%arg0: i32) -> (i32, i32) {
    %c0_i32 = arith.constant 0 : i32
    %c0_i32_0 = arith.constant 0 : i32
    %c0_i32_1 = arith.constant 0 : i32
    return %c0_i32, %c0_i32_0 : i32, i32
  }
  func.func @transform_4(%arg0: i32) -> (i32, i32) {
    %c0_i32 = arith.constant 0 : i32
    %c0_i32_0 = arith.constant 0 : i32
    %c0_i32_1 = arith.constant 0 : i32
    return %c0_i32, %c0_i32_0 : i32, i32
  }
  func.func @transform_5(%arg0: i32) -> (i32, i32) {
    %c0_i32 = arith.constant 0 : i32
    %c0_i32_0 = arith.constant 0 : i32
    %c0_i32_1 = arith.constant 0 : i32
    return %c0_i32, %c0_i32_0 : i32, i32
  }
  func.func @transform_6(%arg0: i32) -> (i32, i32) {
    %c0_i32 = arith.constant 0 : i32
    %c0_i32_0 = arith.constant 0 : i32
    %c0_i32_1 = arith.constant 0 : i32
    return %c0_i32, %c0_i32_0 : i32, i32
  }
}

</mosaic_0001>

<bundles_post_ra>
// kernel: tpu_custom_call.1
= control target key start
LH: loop header
LB: loop body
LE: loop exit
PB: predicated region body
PF: predicated region fallthrough
CT: control target
= control target key end

     0   :  { %vm26_vm0 = vcmask 64512   ;;  %s1127_s0 = inlined_call_operand.vmem [shape: f32[16,8], index: 0, kind: input, shape index: {}]   ;;  %s1128_s1 = inlined_call_operand.vmem [shape: f32[16,8], index: 1, kind: input, shape index: {}]   ;;  %s1129_s2 = inlined_call_operand.vmem [shape: f32[32,96], index: 2, kind: input, shape index: {}]   ;;  %s1130_s3 = inlined_call_operand.vmem [shape: f32[12,96], index: 3, kind: input, shape index: {}]   ;;  %s1131_s4 = inlined_call_operand.vmem [shape: f32[96,32], index: 4, kind: input, shape index: {}]   ;;  %s1132_s5 = inlined_call_operand.vmem [shape: f32[8,32], index: 5, kind: input, shape index: {}]   ;;  %s1133_s6 = inlined_call_operand.hbm [shape: f32[32,32], index: 6, kind: output, shape index: {}]  }
   0x1   :  { %v994_v0 = vld [vmem:[%s1128_s1] sm:$0xff]  ;;  %v999_v1 = vld [vmem:[%s1128_s1 + $0x8] sm:$0xff] }
   0x2   :  { %11 = vsyncpa [#allocation5], 0  ;;  %v866_v2 = vpack.c.bf16 %v999_v1, %v994_v0  ;;  %798 = vmatprep.mubr.msk.f32.mxu0 %vm26_vm0, %v994_v0  ;;  %vm110_vm2 = vcmask 130048   ;;  %v133_v19 = vlaneseq  ;;  %v949_v23 = vmov 0.0   ;;  %v241_v26 = vld [vmem:[%s1127_s0] sm:$0xff]  ;;  %v242_v27 = vld [vmem:[%s1127_s0 + $0x8] sm:$0xff] }
   0x3   :  { %vm867_vm1 = vmpackc.low %vm26_vm0, %vm26_vm0  ;;  %v876_v28 = vpack.c.bf16 %v242_v27, %v241_v26  ;;  %vm356_vm5 = vcmask 31744   ;;  %s950_s0 = smov 4   ;;  %s951_s28 = smov 124   ;;  %vm367_vm6 = vcmask 64544   ;;  %v405_v55 = vld [vmem:[%s1130_s3] sm:$0xff]  ;;  %vm420_vm7 = vcmask 1043456  }
   0x4   :  { %868 = vmatprep.subr.msk.bf16.mxu0 %vm867_vm1, %v866_v2  ;;  %v134_v20 = vshrl.u32 %v133_v19, 7  ;;  %v137_v21 = vand.u32 127, %v133_v19  ;;  %v406_v56 = vld [vmem:[%s1130_s3 + $0x8] sm:$0xf]  ;;  %vm952_vm8 = vmmov 1   ;;  %s953_s9 = smov 8  }
   0x5   :  { %871 = vmatpush3.bf16.xpose.msk.msra.mxu0 %vm867_vm1, %v866_v2  ;;  %877 = vmatprep.subr.bf16.mxu1 %v876_v28  ;;  %v880_v57 = vpack.c.bf16 %v406_v56, %v405_v55  ;;  %vm881_vm9 = vmpackc.low %vm420_vm7, %vm952_vm8  ;;  %v517_v60 = vld [vmem:[%s1131_s4] sm:$0xff]  ;;  %v518_v61 = vld [vmem:[%s1131_s4 + $0x8] sm:$0xff]  ;;  %vm378_vm10 = vcmask 97344   ;;  %vm407_vm11 = vcmask 97280   ;;  %vm529_vm12 = vcmask 785408   ;;  %s954_s15 = smov [#allocation4]  }
   0x6   :  { %v135_v22 = vadd.s32 8, %v134_v20  ;;  %vm138_vm3 = vcmp.eq.s32.totalorder %v134_v20, %v137_v21  ;;  %879 = vmatpush3.bf16.msra.mxu1 %v876_v28  ;;  %v519_v62 = vld [vmem:[%s1131_s4 + $0x10] sm:$0xff]  ;;  %v886_v63 = vpack.c.bf16 %v518_v61, %v517_v60  ;;  %v520_v2 = vld [vmem:[%s1131_s4 + $0x18] sm:$0xff]  ;;  %v510_v27 = vld [vmem:[%s1129_s2 + $0x8] sm:$0xff]  ;;  %vm705_vm13 = vcmask 261120   ;;  %s717_s16 = sshll.u32 %s954_s15, 4  ;;  %s718_s16 = int_to_ptr.vmem [resolvable:$true] %s717_s16 }
   0x7   :  { %v732_v24 = vsel %vm138_vm3, 1.0, %v949_v23  ;;  %p930_p1 = scmp.lt.s32.totalorder %s718_s16, %s718_s16 }
   0x8   :  { %vm139_vm4 = vcmp.eq.s32.totalorder %v135_v22, %v137_v21  ;;  %144 = vst.msk [vmem:[#allocation2] sm:$0xff] %vm110_vm2, %v732_v24  ;;  %887 = vmatprep.subr.bf16.mxu1 %v886_v63  ;;  %v527_v22 = vld [vmem:[%s1131_s4 + $0x50] sm:$0xff] }
   0x9   :  { %v733_v25 = vsel %vm139_vm4, 1.0, %v949_v23  ;;  %v528_v23 = vld [vmem:[%s1131_s4 + $0x58] sm:$0xff] }
   0xa   :  { %145 = vst.msk [vmem:[#allocation2 + $0x8] sm:$0xff] %vm110_vm2, %v733_v25 }
   0xc   :  { %799 = vmatmul.mubr.msk.f32.vlgmr.msra.gmra.mrb[0].mxu0 %vm26_vm0, %v999_v1 }
   0xf   :  { %v235_v29 = vld [vmem:[#allocation2] sm:$0xff] }
  0x10   :  { %812 = vmatprep.mubr.msk.f32.mxu1 %vm110_vm2, %v235_v29 }
  0x11   :  { %v236_v30 = vld [vmem:[#allocation2 + $0x8] sm:$0xff] }
  0x12   :  { %813 = vmatmul.mubr.msk.f32.vlgmr.msra.gmra.mrb[0].mxu1 %vm110_vm2, %v236_v30 }
  0x13   :  { %889 = vmatpush3.bf16.msra.mxu1 %v886_v63 }
  0xdf   :  { %v800_v3 = vpop.f32.mrb[0].mxu0 }
  0xe0   :  { %v99_v4 = vpop.f32.mrb[1].mxu0  ;;  %v109_v6 = vmax.f32 %v800_v3, 0.0  ;;  %v890_v3 = vpack.c.bf16 %v520_v2, %v519_v62 }
  0xe1   :  { %v108_v5 = vmax.f32 %v99_v4, 0.0  ;;  %v521_v4 = vld [vmem:[%s1131_s4 + $0x20] sm:$0xff] }
  0xe2   :  { %v114_v8 = vsel %vm110_vm2, %v109_v6, -inf  ;;  %891 = vmatprep.subr.bf16.mxu1 %v890_v3 }
  0xe3   :  { %v111_v7 = vsel %vm110_vm2, %v108_v5, -inf  ;;  %893 = vmatpush3.bf16.msra.mxu1 %v890_v3 }
  0xe4   :  { %112 = vmax.xlane.f32.xlu0 %v111_v7  ;;  %v523_v7 = vld [vmem:[%s1131_s4 + $0x30] sm:$0xff] }
  0xe5   :  { %v814_v40 = vpop.f32.mrb[0].mxu1 }
  0xe6   :  { %v327_v41 = vpop.f32.mrb[1].mxu1  ;;  %358 = vst.msk [vmem:[#allocation3 + $0x8] sm:$0xff] %vm356_vm5, %v814_v40 }
  0xe7   :  { %357 = vst.msk [vmem:[#allocation3] sm:$0xff] %vm356_vm5, %v327_v41 }
  0xe8   :  { %115 = vmax.xlane.f32.xlu0 %v114_v8  ;;  %v524_v8 = vld [vmem:[%s1131_s4 + $0x38] sm:$0xff] }
 0x171   :  { %v113_v9 = vpop.xlane.xlu0 %112 }
 0x172   :  { %v117_v10 = vsub.f32 %v108_v5, %v113_v9  ;;  %v522_v5 = vld [vmem:[%s1131_s4 + $0x28] sm:$0xff]  ;;  %v898_v9 = vpack.c.bf16 %v524_v8, %v523_v7 }
 0x174   :  { %v119_v11 = vmul.f32 1.442695, %v117_v10  ;;  %v525_v10 = vld [vmem:[%s1131_s4 + $0x40] sm:$0xff] }
 0x175   :  { %v116_v12 = vpop.xlane.xlu0 %115 }
 0x176   :  { %917 = vpow2.f32 %v119_v11  ;;  %v118_v13 = vsub.f32 %v109_v6, %v116_v12  ;;  %v894_v6 = vpack.c.bf16 %v522_v5, %v521_v4  ;;  %v526_v11 = vld [vmem:[%s1131_s4 + $0x48] sm:$0xff] }
 0x177   :  { %v902_v12 = vpack.c.bf16 %v526_v11, %v525_v10 }
 0x178   :  { %v121_v14 = vmul.f32 1.442695, %v118_v13  ;;  %895 = vmatprep.subr.bf16.mxu1 %v894_v6 }
 0x179   :  { %897 = vmatpush3.bf16.msra.mxu1 %v894_v6 }
 0x17a   :  { %919 = vpow2.f32 %v121_v14  ;;  %899 = vmatprep.subr.bf16.mxu1 %v898_v9 }
 0x17d   :  { %901 = vmatpush3.bf16.msra.mxu1 %v898_v9 }
 0x17e   :  { %903 = vmatprep.subr.bf16.mxu1 %v902_v12 }
 0x180   :  { %v918_v15 = vpop.eup %917 }
 0x181   :  { %v123_v16 = vsel %vm110_vm2, %v918_v15, 0.0  ;;  %905 = vmatpush3.bf16.msra.mxu1 %v902_v12 }
 0x182   :  { %124 = vadd.xlane.f32.xlu1 %v123_v16 }
 0x184   :  { %v920_v17 = vpop.eup %919 }
 0x185   :  { %v126_v18 = vsel %vm110_vm2, %v920_v17, 0.0 }
 0x186   :  { %127 = vadd.xlane.f32.xlu1 %v126_v18 }
 0x20f   :  { %v125_v31 = vpop.xlane.xlu1 %124 }
 0x210   :  { %921 = vrcp.f32 %v125_v31  ;;  %v511_v31 = vld [vmem:[%s1129_s2 + $0x10] sm:$0xff] }
 0x213   :  { %v128_v32 = vpop.xlane.xlu1 %127 }
 0x214   :  { %923 = vrcp.f32 %v128_v32  ;;  %v512_v32 = vld [vmem:[%s1129_s2 + $0x18] sm:$0xff] }
 0x21a   :  { %v922_v33 = vpop.eup %921 }
 0x21b   :  { %v130_v34 = vmul.f32 %v922_v33, %v918_v15 }
 0x21d   :  { %146 = vst.msk [vmem:[#allocation2 + $0x10] sm:$0xff] %vm110_vm2, %v130_v34  ;;  %805 = vmatprep.mubr.msk.f32.mxu0 %vm110_vm2, %v130_v34 }
 0x21e   :  { %v924_v35 = vpop.eup %923 }
 0x21f   :  { %v132_v36 = vmul.f32 %v924_v35, %v920_v17 }
 0x221   :  { %147 = vst.msk [vmem:[#allocation2 + $0x18] sm:$0xff] %vm110_vm2, %v132_v36  ;;  %v872_v37 = vpack.c.bf16 %v132_v36, %v130_v34 }
 0x223   :  { %873 = vmatprep.subr.bf16.mxu0 %v872_v37 }
 0x224   :  { %875 = vmatpush3.bf16.msra.mxu0 %v872_v37  ;;  %v237_v38 = vld [vmem:[#allocation2 + $0x10] sm:$0xff] }
 0x225   :  { %815 = vmatprep.mubr.msk.f32.mxu1 %vm110_vm2, %v237_v38  ;;  %882 = vmatprep.subr.msk.bf16.mxu0 %vm881_vm9, %v880_v57 }
 0x227   :  { %806 = vmatmul.mubr.msk.f32.vlgmr.msra.gmra.mrb[2].mxu0 %vm110_vm2, %v132_v36 }
 0x228   :  { %v238_v39 = vld [vmem:[#allocation2 + $0x18] sm:$0xff]  ;;  %885 = vmatpush3.bf16.msk.msra.mxu0 %vm881_vm9, %v880_v57 }
 0x229   :  { %816 = vmatmul.mubr.msk.f32.gmra.mrb[2].mxu1 %vm110_vm2, %v238_v39 }
 0x2fa   :  { %v807_v42 = vpop.f32.mrb[2].mxu0 }
 0x2fb   :  { %v230_v43 = vmul.f32 2.0, %v807_v42  ;;  %v220_v44 = vpop.f32.mrb[3].mxu0 }
 0x2fc   :  { %v229_v45 = vmul.f32 2.0, %v220_v44  ;;  %v1031_v46 = vpop.f32.mrb[2].mxu1 }
 0x2fd   :  { %v232_v47 = vsub.f32 %v230_v43, %v733_v25  ;;  %363 = vrot.lane.b32.xlu1 %v1031_v46, %s950_s0  ;;  %v337_v48 = vpop.f32.mrb[3].mxu1  ;;  %v627_v25 = vld [vmem:[%s1132_s5] sm:$0xff] }
 0x2fe   :  { %v231_v49 = vsub.f32 %v229_v45, %v732_v24  ;;  %361 = vrot.lane.b32.xlu0 %v337_v48, %s950_s0  ;;  %v906_v24 = vpack.c.bf16 %v528_v23, %v527_v22  ;;  %861 = vmatprep.subr.mxu0 %v627_v25 }
 0x2ff   :  { %234 = vst.msk [vmem:[#allocation2 + $0x28] sm:$0xff] %vm110_vm2, %v232_v47 }
 0x300   :  { %233 = vst.msk [vmem:[#allocation2 + $0x20] sm:$0xff] %vm110_vm2, %v231_v49  ;;  %907 = vmatprep.subr.bf16.mxu1 %v906_v24 }
 0x301   :  { %909 = vmatpush3.bf16.msra.mxu1 %v906_v24 }
 0x302   :  { %383 = vrot.lane.b32.xlu0 %v327_v41, %s951_s28 }
 0x306   :  { %v240_v51 = vld [vmem:[#allocation2 + $0x28] sm:$0xff] }
 0x307   :  { %v239_v50 = vld [vmem:[#allocation2 + $0x20] sm:$0xff] }
 0x308   :  { %818 = vmatprep.mubr.msk.f32.mxu1 %vm110_vm2, %v239_v50 }
 0x309   :  { %819 = vmatmul.mubr.msk.f32.gmra.mrb[4].mxu1 %vm110_vm2, %v240_v51 }
 0x36f   :  { %v364_v52 = vpop.permute.xlu1 %363 }
 0x370   :  { %369 = vst.msk [vmem:[#allocation3 + $0x8] sm:$0xff] %vm367_vm6, %v364_v52  ;;  %v362_v53 = vpop.permute.xlu0 %361 }
 0x371   :  { %368 = vst.msk [vmem:[#allocation3] sm:$0xff] %vm367_vm6, %v362_v53 }
 0x374   :  { %v384_v54 = vpop.permute.xlu0 %383 }
 0x375   :  { %389 = vst.msk [vmem:[#allocation3 + $0x10] sm:$0xff] %vm356_vm5, %v384_v54 }
 0x376   :  { %391 = vst.msk [vmem:[#allocation3 + $0x10] sm:$0xff] %vm367_vm6, %v337_v48 }
 0x3dc   :  { %v820_v58 = vpop.f32.mrb[4].mxu1 }
 0x3dd   :  { %374 = vrot.lane.b32.xlu1 %v820_v58, %s953_s9  ;;  %v347_v59 = vpop.f32.mrb[5].mxu1 }
 0x3de   :  { %393 = vrot.lane.b32.xlu0 %v347_v59, %s950_s0 }
 0x3e1   :  { %372 = vrot.lane.b32.xlu1 %v347_v59, %s953_s9 }
 0x3e5   :  { %385 = vrot.lane.b32.xlu1 %v814_v40, %s951_s28 }
 0x3e9   :  { %395 = vrot.lane.b32.xlu1 %v820_v58, %s950_s0 }
 0x44f   :  { %v375_v13 = vpop.permute.xlu1 %374 }
 0x450   :  { %380 = vst.msk [vmem:[#allocation3 + $0x8] sm:$0xff] %vm378_vm10, %v375_v13  ;;  %v394_v14 = vpop.permute.xlu0 %393 }
 0x451   :  { %399 = vst.msk [vmem:[#allocation3 + $0x10] sm:$0xff] %vm378_vm10, %v394_v14 }
 0x453   :  { %v373_v15 = vpop.permute.xlu1 %372 }
 0x454   :  { %379 = vst.msk [vmem:[#allocation3] sm:$0xff] %vm378_vm10, %v373_v15 }
 0x457   :  { %v386_v16 = vpop.permute.xlu1 %385  ;;  %v402_v19 = vld [vmem:[#allocation3 + $0x8] sm:$0xff] }
 0x458   :  { %390 = vst.msk [vmem:[#allocation3 + $0x18] sm:$0xff] %vm356_vm5, %v386_v16  ;;  %v403_v20 = vld [vmem:[#allocation3 + $0x10] sm:$0xff] }
 0x459   :  { %392 = vst.msk [vmem:[#allocation3 + $0x18] sm:$0xff] %vm367_vm6, %v1031_v46 }
 0x45b   :  { %v396_v17 = vpop.permute.xlu1 %395  ;;  %v401_v18 = vld [vmem:[#allocation3] sm:$0xff] }
 0x45c   :  { %400 = vst.msk [vmem:[#allocation3 + $0x18] sm:$0xff] %vm378_vm10, %v396_v17  ;;  %825 = vmatprep.mubr.msk.f32.mxu0 %vm407_vm11, %v401_v18 }
 0x45d   :  { %826 = vmatmul.mubr.msk.f32.vlgmr.msra.gmra.mrb[4].mxu0 %vm407_vm11, %v402_v19 }
 0x45e   :  { %828 = vmatprep.mubr.msk.f32.mxu0 %vm407_vm11, %v403_v20  ;;  %862 = vmatpush3.msra.mxu0 %v627_v25 }
 0x463   :  { %v404_v21 = vld [vmem:[#allocation3 + $0x18] sm:$0xff] }
 0x464   :  { %829 = vmatmul.mubr.msk.f32.gmra.mrb[6].mxu0 %vm407_vm11, %v404_v21 }
 0x465   :  { %863 = vmatprep.mubr.msk.f32.mxu0 %vm26_vm0, %v994_v0  ;;  %v509_v0 = vld [vmem:[%s1129_s2] sm:$0xff]  ;;  %s925_s2 = scalar_lea.vmem %s718_s16, 512 }
 0x466   :  { %p926_p0 = scmp.ne.s32.totalorder %s718_s16, %s925_s2  ;;  %p931_p2 = scmp.lt.s32.totalorder %s925_s2, %s925_s2 }
 0x468   :  { %864 = vmatmul.mubr.msk.f32.vlgmr.msra.gmra.mrb[8].mxu0 %vm26_vm0, %v999_v1  ;;  %p932_p3 = por %p931_p2, %p930_p1 }
 0x46a   :  { %p933_p4 = pnand %p932_p3, %p926_p0 }
 0x530   :  { %v827_v26 = vpop.f32.mrb[4].mxu0 }
 0x531   :  { %v490_v28 = vpop.f32.mrb[5].mxu0  ;;  %v514_v30 = vmul.f32 %v827_v26, %v510_v27 }
 0x532   :  { %v513_v29 = vmul.f32 %v509_v0, %v490_v28 }
 0x534   :  { %855 = vmatprep.mubr.msk.f32.mxu1 %vm529_vm12, %v513_v29 }
 0x535   :  { %856 = vmatmul.mubr.msk.f32.vlgmr.msra.gmra.mrb[6].mxu1 %vm529_vm12, %v514_v30 }
 0x537   :  { %v830_v1 = vpop.f32.mrb[6].mxu0 }
 0x538   :  { %v500_v33 = vpop.f32.mrb[7].mxu0  ;;  %v516_v35 = vmul.f32 %v830_v1, %v512_v32 }
 0x539   :  { %v515_v34 = vmul.f32 %v511_v31, %v500_v33 }
 0x53b   :  { %858 = vmatprep.mubr.msk.f32.mxu1 %vm529_vm12, %v515_v34  ;;  %v865_v36 = vpop.f32.mrb[8].mxu0 }
 0x53c   :  { %859 = vmatmul.mubr.msk.f32.gmra.mrb[8].mxu1 %vm529_vm12, %v516_v35  ;;  %v694_v37 = vpop.f32.mrb[9].mxu0 }
 0x608   :  { %v857_v38 = vpop.f32.mrb[6].mxu1 }
 0x609   :  { %v704_v39 = vadd.f32 %v865_v36, %v857_v38  ;;  %v608_v40 = vpop.f32.mrb[7].mxu1 }
 0x60a   :  { %v703_v41 = vadd.f32 %v694_v37, %v608_v40 }
 0x60b   :  { %707 = vst.msk [vmem:[#allocation4 + $0x8] sm:$0xff] %vm705_vm13, %v704_v39 }
 0x60c   :  { %706 = vst.msk [vmem:[#allocation4] sm:$0xff] %vm705_vm13, %v703_v41 }
 0x60f   :  { %v860_v42 = vpop.f32.mrb[8].mxu1 }
 0x610   :  { %v709_v43 = vadd.f32 %v865_v36, %v860_v42  ;;  %v618_v44 = vpop.f32.mrb[9].mxu1 }
 0x611   :  { %v708_v45 = vadd.f32 %v694_v37, %v618_v44 }
 0x612   :  { %711 = vst.msk [vmem:[#allocation4 + $0x18] sm:$0xff] %vm705_vm13, %v709_v43 }
 0x613   :  { %710 = vst.msk [vmem:[#allocation4 + $0x10] sm:$0xff] %vm705_vm13, %v708_v45 }
 0x614   :  { %936 = shalt.err (!%p933_p4)
}
 0x615   :  { %s937_s19 = scalar_lea.hbm %s1133_s6, 512 }
 0x616   :  { %p938_p5 = scmp.ne.s32.totalorder %s1133_s6, %s937_s19  ;;  %p941_p6 = scmp.lt.u32.totalorder %s937_s19, %s1133_s6 }
 0x618   :  { %p943_p7 = pnand %p941_p6, %p938_p5 }
 0x61a   :  { %946 = shalt.err (!%p943_p7)
}
 0x61b   :  { %s955_s24 = smov 128  }
 0x61c   :  { %723 = dma.vmem_to_hbm [thread:$0]  %s718_s16, 512, %s1133_s6, [#allocation5], %s955_s24, %s955_s24, %s953_s9  }
 0x61d   :  { %947 = dma.done.wait [#allocation5], 512  }
 0x61e   :  { %948 = vsyncadd [#allocation5], 4294966784 }
 0x61f   :  { %727 = vsyncpa [#allocation5], 1 }

</bundles_post_ra>
